<compile_context>
chip_gen: v5e
topology: v5e:2x2
jax: 0.10.0
libtpu: 0.0.40
codegen_flags: <defaults>
</compile_context>

<pallas_src>
import functools

import jax
import jax.numpy as jnp
from jax.experimental import pallas as pl
from jax.experimental.pallas import tpu as pltpu

EPS = 1e-6
LANES = 128
SUBLANES = 8

_SINGLE_TC_TAGS = ("v5e", "v5 lite", "v5lite", "v6e", "v6 lite", "v6lite")


def _num_tensorcores() -> int:
    """Best-effort TensorCore count from device_kind.

    Defaults to 2: the 2-way split is always correct (the overhang tile is
    fully masked), so missing a dual-TC chip would cost 2x but a false
    positive only wastes one tile's DMA on a single-TC chip.
    """
    try:
        kind = jax.devices()[0].device_kind.lower()
    except Exception:
        return 2
    if any(tag in kind for tag in _SINGLE_TC_TAGS):
        return 1
    return 2


def _charbonnier_sum_kernel(x_ref, y_ref, o_ref, *, full_rows, tile_rows, steps):
    c = pl.program_id(0)           # core-split axis ("parallel")
    i = pl.program_id(1)           # reduction axis ("arbitrary")
    tile = c * steps + i           # logical (unclamped) tile index
    start = tile * tile_rows       # first global row covered by this tile

    @pl.when(i == 0)
    def _():
        o_ref[...] = jnp.zeros_like(o_ref)

    # Cast in VMEM (inputs are read from HBM in their native dtype).
    d = x_ref[...].astype(jnp.float32) - y_ref[...].astype(jnp.float32)
    err = jnp.sqrt(d * d + jnp.float32(EPS))

    def accum(e):
        # vreg-shaped partial sums: per-step work stays on the VPU, no per-step
        # cross-lane reduction, good f32 accumulation for large N.
        o_ref[...] += jnp.sum(
            e.reshape(tile_rows // SUBLANES, SUBLANES, LANES), axis=0)

    interior = start + tile_rows <= full_rows

    @pl.when(interior)
    def _():
        # Bulk path: no iota / compare / select -> stays HBM-bound.
        accum(err)

    @pl.when(jnp.logical_not(interior))
    def _():
        # Tail / overhang path: row mask only (lane tail handled in JAX).
        # Uses the *unclamped* start, so a clamped overhang tile on the
        # second core is fully masked (no double counting); jnp.where is a
        # select, so garbage/NaN in OOB edge-block rows cannot leak in.
        row = jax.lax.broadcasted_iota(jnp.int32, (tile_rows, LANES), 0)
        mask = (start + row) < full_rows
        accum(jnp.where(mask, err, jnp.float32(0.0)))


def charbonnier_loss(inputs, targets, *, tile_rows=8192):
    """Pallas TPU implementation of Charbonnier_loss.forward."""
    assert inputs.shape == targets.shape
    x = inputs.reshape(-1)
    y = targets.reshape(-1)
    n = x.size

    full_rows = n // LANES
    rem = n - full_rows * LANES

    # <=127-element tail: reduce directly in JAX.  This avoids the full-array
    # jnp.pad read+write copy of both inputs when n is not lane-aligned and
    # removes the lane portion of the in-kernel mask entirely.
    if rem:
        dt = (x[full_rows * LANES:].astype(jnp.float32)
              - y[full_rows * LANES:].astype(jnp.float32))
        tail_sum = jnp.sum(jnp.sqrt(dt * dt + jnp.float32(EPS)))
    else:
        tail_sum = jnp.float32(0.0)

    if full_rows == 0:             # tiny input: everything fits in the tail
        return tail_sum / jnp.float32(n)

    x2 = x[: full_rows * LANES].reshape(full_rows, LANES)
    y2 = y[: full_rows * LANES].reshape(full_rows, LANES)

    # Sublane packing for the native dtype: 8 rows (f32/i32), 16 (bf16/f16),
    # 32 (int8/fp8).  Keeps packed dtypes on their minimum tile.
    itemsize = jnp.dtype(x2.dtype).itemsize
    pack = SUBLANES * max(1, 4 // itemsize)

    # Tile sizing: multi-MiB blocks amortize the ~0.35us per-grid-step
    # overhead; capped so 2 inputs x 2 pipeline buffers stay under the input
    # VMEM budget (24 MiB), which itself sits under the explicit
    # vmem_limit_bytes below (and under v7x's 64 MiB physical VMEM).
    in_budget = 24 * 1024 * 1024                   # 2 inputs x 2 buffers
    tr_cap = in_budget // (4 * LANES * itemsize)
    rows_pack = ((full_rows + pack - 1) // pack) * pack
    tr = int(min(max(tile_rows, pack), tr_cap, rows_pack))
    tr = max(pack, (tr // pack) * pack)

    total_tiles = int(pl.cdiv(full_rows, tr))
    n_split = 2 if (_num_tensorcores() >= 2 and total_tiles >= 2) else 1
    steps = int(pl.cdiv(total_tiles, n_split))
    last_tile = total_tiles - 1

    def in_map(c, i):
        # Clamp so the (fully masked) overhang tile on the second core never
        # addresses past the end of the array.
        return (jnp.minimum(c * steps + i, last_tile), 0)

    kernel = functools.partial(
        _charbonnier_sum_kernel, full_rows=full_rows, tile_rows=tr, steps=steps)

    # Explicit VMEM budget: double-buffered inputs + accumulator + headroom.
    vmem_limit = int(min(48 * 1024 * 1024,
                         max(16 * 1024 * 1024,
                             4 * tr * LANES * itemsize + 4 * 1024 * 1024)))

    partials = pl.pallas_call(
        kernel,
        out_shape=jax.ShapeDtypeStruct((n_split, SUBLANES, LANES), jnp.float32),
        grid_spec=pltpu.PrefetchScalarGridSpec(
            num_scalar_prefetch=0,
            grid=(n_split, steps),
            in_specs=[
                pl.BlockSpec((tr, LANES), in_map),
                pl.BlockSpec((tr, LANES), in_map),
            ],
            out_specs=pl.BlockSpec((None, SUBLANES, LANES),
                                   lambda c, i: (c, 0, 0)),
        ),
        compiler_params=pltpu.CompilerParams(
            dimension_semantics=("parallel", "arbitrary"),
            vmem_limit_bytes=vmem_limit),
    )(x2, y2)

    return (jnp.sum(partials) + tail_sum) / jnp.float32(n)


def charbonnier_loss_ref(inputs, targets):
    d = inputs.astype(jnp.float32) - targets.astype(jnp.float32)
    return jnp.mean(jnp.sqrt(d * d + EPS))


if __name__ == "__main__":
    key = jax.random.PRNGKey(0)
    k1, k2 = jax.random.split(key)

    # NCHW, same convention as the PyTorch module's typical inputs.
    x = jax.random.normal(k1, (2, 4, 16, 16), dtype=jnp.float32)
    y = jax.random.normal(k2, (2, 4, 16, 16), dtype=jnp.float32)
    loss = charbonnier_loss(x, y)
    jax.block_until_ready(loss)
    ref = charbonnier_loss_ref(x, y)
    assert jnp.allclose(loss, ref, rtol=1e-5, atol=1e-6), (loss, ref)

    # Non-lane-aligned size: exercises the JAX tail reduction, the pl.when
    # masked tail-tile branch, and (on dual-TC chips) the core-split path.
    k3, k4 = jax.random.split(k2)
    x2 = jax.random.normal(k3, (1, 3, 23, 29), dtype=jnp.float32)
    y2 = jax.random.normal(k4, (1, 3, 23, 29), dtype=jnp.float32)
    loss2 = charbonnier_loss(x2, y2, tile_rows=8)
    jax.block_until_ready(loss2)
    ref2 = charbonnier_loss_ref(x2, y2)
    assert jnp.allclose(loss2, ref2, rtol=1e-5, atol=1e-6), (loss2, ref2)

    print("KERNEL_OK")
</pallas_src>

<mosaic_0001>
module attributes {stable_mosaic.version = 11 : i64} {
  func.func @_charbonnier_sum_kernel(%arg0: i32, %arg1: i32, %arg2: memref<16x128xf32, #tpu.memory_space<vmem>>, %arg3: memref<16x128xf32, #tpu.memory_space<vmem>>, %arg4: memref<1x8x128xf32, #tpu.memory_space<vmem>>) attributes {dimension_semantics = [#tpu.dimension_semantics<parallel>, #tpu.dimension_semantics<arbitrary>], iteration_bounds = array<i64: 1, 1>, scalar_prefetch = 0 : i64, scratch_operands = 0 : i64, tpu.core_type = #tpu.core_type<tc>, window_params = [{transform_indices = @transform_0, window_bounds = array<i64: 16, 128>}, {transform_indices = @transform_1, window_bounds = array<i64: 16, 128>}, {transform_indices = @transform_2, window_bounds = array<i64: 1, 8, 128>}]} {
    %c1_i32 = arith.constant 1 : i32
    %0 = arith.muli %arg0, %c1_i32 : i32
    %1 = arith.addi %0, %arg1 : i32
    %c16_i32 = arith.constant 16 : i32
    %2 = arith.muli %1, %c16_i32 : i32
    %c0_i32 = arith.constant 0 : i32
    %3 = arith.cmpi eq, %arg1, %c0_i32 : i32
    %4 = arith.extui %3 : i1 to i32
    %c0_i32_0 = arith.constant 0 : i32
    %5 = arith.cmpi ne, %4, %c0_i32_0 : i32
    scf.if %5 {
      %cst_8 = arith.constant 0.000000e+00 : f32
      %20 = vector.broadcast %cst_8 : f32 to vector<8x128xf32>
      %c0_9 = arith.constant 0 : index
      %c0_10 = arith.constant 0 : index
      %c0_11 = arith.constant 0 : index
      %21 = vector.load %arg4[%c0_9, %c0_10, %c0_11] : memref<1x8x128xf32, #tpu.memory_space<vmem>>, vector<1x8x128xf32>
      %22 = vector.shape_cast %21 : vector<1x8x128xf32> to vector<8x128xf32>
      %23 = vector.shape_cast %20 : vector<8x128xf32> to vector<1x8x128xf32>
      tpu.vector_store %arg4[%c0_9, %c0_10, %c0_11], %23 {strides = array<i32>} : memref<1x8x128xf32, #tpu.memory_space<vmem>>, vector<1x8x128xf32>,
    } else {
    }
    %c0 = arith.constant 0 : index
    %c0_1 = arith.constant 0 : index
    %6 = vector.load %arg2[%c0, %c0_1] : memref<16x128xf32, #tpu.memory_space<vmem>>, vector<16x128xf32>
    %c0_2 = arith.constant 0 : index
    %c0_3 = arith.constant 0 : index
    %7 = vector.load %arg3[%c0_2, %c0_3] : memref<16x128xf32, #tpu.memory_space<vmem>>, vector<16x128xf32>
    %8 = arith.subf %6, %7 : vector<16x128xf32>
    %9 = arith.mulf %8, %8 : vector<16x128xf32>
    %cst = arith.constant 9.99999997E-7 : f32
    %10 = vector.broadcast %cst : f32 to vector<16x128xf32>
    %11 = arith.addf %9, %10 : vector<16x128xf32>
    %12 = math.sqrt %11 : vector<16x128xf32>
    %c16_i32_4 = arith.constant 16 : i32
    %13 = arith.addi %2, %c16_i32_4 : i32
    %c16_i32_5 = arith.constant 16 : i32
    %14 = arith.cmpi sle, %13, %c16_i32_5 : i32
    %15 = arith.extui %14 : i1 to i32
    %c0_i32_6 = arith.constant 0 : i32
    %16 = arith.cmpi ne, %15, %c0_i32_6 : i32
    scf.if %16 {
      %c0_8 = arith.constant 0 : index
      %c0_9 = arith.constant 0 : index
      %c0_10 = arith.constant 0 : index
      %20 = vector.load %arg4[%c0_8, %c0_9, %c0_10] : memref<1x8x128xf32, #tpu.memory_space<vmem>>, vector<1x8x128xf32>
      %21 = vector.shape_cast %20 : vector<1x8x128xf32> to vector<8x128xf32>
      %22 = vector.shape_cast %12 : vector<16x128xf32> to vector<2x8x128xf32>
      %cst_11 = arith.constant dense<0.000000e+00> : vector<8x128xf32>
      %23 = vector.multi_reduction <add>, %22, %cst_11 [0] : vector<2x8x128xf32> to vector<8x128xf32>
      %24 = arith.addf %21, %23 : vector<8x128xf32>
      %c0_12 = arith.constant 0 : index
      %c0_13 = arith.constant 0 : index
      %c0_14 = arith.constant 0 : index
      %25 = vector.load %arg4[%c0_12, %c0_13, %c0_14] : memref<1x8x128xf32, #tpu.memory_space<vmem>>, vector<1x8x128xf32>
      %26 = vector.shape_cast %25 : vector<1x8x128xf32> to vector<8x128xf32>
      %27 = vector.shape_cast %24 : vector<8x128xf32> to vector<1x8x128xf32>
      tpu.vector_store %arg4[%c0_12, %c0_13, %c0_14], %27 {strides = array<i32>} : memref<1x8x128xf32, #tpu.memory_space<vmem>>, vector<1x8x128xf32>,
    } else {
    }
    %true = arith.constant true
    %17 = arith.xori %14, %true : i1
    %18 = arith.extui %17 : i1 to i32
    %c0_i32_7 = arith.constant 0 : i32
    %19 = arith.cmpi ne, %18, %c0_i32_7 : i32
    scf.if %19 {
      %20 = tpu.iota {dimensions = array<i32: 0>} : vector<16x128xi32>
      %21 = vector.broadcast %2 : i32 to vector<16x128xi32>
      %22 = arith.addi %21, %20 : vector<16x128xi32>
      %c16_i32_8 = arith.constant 16 : i32
      %23 = vector.broadcast %c16_i32_8 : i32 to vector<16x128xi32>
      %24 = arith.cmpi slt, %22, %23 : vector<16x128xi32>
      %cst_9 = arith.constant 0.000000e+00 : f32
      %25 = vector.broadcast %cst_9 : f32 to vector<16x128xf32>
      %26 = arith.select %24, %12, %25 : vector<16x128xi1>, vector<16x128xf32>
      %c0_10 = arith.constant 0 : index
      %c0_11 = arith.constant 0 : index
      %c0_12 = arith.constant 0 : index
      %27 = vector.load %arg4[%c0_10, %c0_11, %c0_12] : memref<1x8x128xf32, #tpu.memory_space<vmem>>, vector<1x8x128xf32>
      %28 = vector.shape_cast %27 : vector<1x8x128xf32> to vector<8x128xf32>
      %29 = vector.shape_cast %26 : vector<16x128xf32> to vector<2x8x128xf32>
      %cst_13 = arith.constant dense<0.000000e+00> : vector<8x128xf32>
      %30 = vector.multi_reduction <add>, %29, %cst_13 [0] : vector<2x8x128xf32> to vector<8x128xf32>
      %31 = arith.addf %28, %30 : vector<8x128xf32>
      %c0_14 = arith.constant 0 : index
      %c0_15 = arith.constant 0 : index
      %c0_16 = arith.constant 0 : index
      %32 = vector.load %arg4[%c0_14, %c0_15, %c0_16] : memref<1x8x128xf32, #tpu.memory_space<vmem>>, vector<1x8x128xf32>
      %33 = vector.shape_cast %32 : vector<1x8x128xf32> to vector<8x128xf32>
      %34 = vector.shape_cast %31 : vector<8x128xf32> to vector<1x8x128xf32>
      tpu.vector_store %arg4[%c0_14, %c0_15, %c0_16], %34 {strides = array<i32>} : memref<1x8x128xf32, #tpu.memory_space<vmem>>, vector<1x8x128xf32>,
    } else {
    }
    return
  }
  func.func @transform_0(%arg0: i32, %arg1: i32) -> (i32, i32) {
    %c1_i32 = arith.constant 1 : i32
    %0 = arith.muli %arg0, %c1_i32 : i32
    %1 = arith.addi %0, %arg1 : i32
    %c0_i32 = arith.constant 0 : i32
    %2 = arith.minsi %1, %c0_i32 : i32
    %c0_i32_0 = arith.constant 0 : i32
    %c0_i32_1 = arith.constant 0 : i32
    return %2, %c0_i32_0 : i32, i32
  }
  func.func @transform_1(%arg0: i32, %arg1: i32) -> (i32, i32) {
    %c1_i32 = arith.constant 1 : i32
    %0 = arith.muli %arg0, %c1_i32 : i32
    %1 = arith.addi %0, %arg1 : i32
    %c0_i32 = arith.constant 0 : i32
    %2 = arith.minsi %1, %c0_i32 : i32
    %c0_i32_0 = arith.constant 0 : i32
    %c0_i32_1 = arith.constant 0 : i32
    return %2, %c0_i32_0 : i32, i32
  }
  func.func @transform_2(%arg0: i32, %arg1: i32) -> (i32, i32, i32) {
    %c0_i32 = arith.constant 0 : i32
    %c0_i32_0 = arith.constant 0 : i32
    %c0_i32_1 = arith.constant 0 : i32
    return %arg0, %c0_i32, %c0_i32_0 : i32, i32, i32
  }
}

</mosaic_0001>

<bundles_post_ra>
// kernel: tpu_custom_call.1
= control target key start
LH: loop header
LB: loop body
LE: loop exit
PB: predicated region body
PF: predicated region fallthrough
CT: control target
= control target key end

     0   :  { %7 = vsyncpa [#allocation3], 0  ;;  %s271_s0 = inlined_call_operand.hbm [shape: f32[16,128], index: 0, kind: input, shape index: {}]   ;;  %s272_s1 = inlined_call_operand.hbm [shape: f32[16,128], index: 1, kind: input, shape index: {}]   ;;  %s273_s2 = inlined_call_operand.hbm [shape: f32[1,8,128], index: 2, kind: output, shape index: {}]  }
   0x1   :  { %8 = vsyncpa [#allocation6], 0 }
   0x2   :  { %9 = vsyncpa [#allocation4], 0  ;;  %s20_s11 = sshll.u32 %s271_s0, 4  ;;  %s242_s12 = smov [#allocation2]   ;;  %s21_s11 = int_to_ptr.hbm [resolvable:$true] %s20_s11 }
   0x3   :  { %s22_s13 = sshll.u32 %s242_s12, 4  ;;  %s39_s16 = sshll.u32 %s272_s1, 4  ;;  %s23_s13 = int_to_ptr.vmem [resolvable:$true] %s22_s13  ;;  %s40_s16 = int_to_ptr.hbm [resolvable:$true] %s39_s16 }
   0x4   :  { %s243_s17 = smov 128   ;;  %s244_s18 = smov 8  }
   0x5   :  { %28 = dma.hbm_to_vmem [thread:$0]  %s21_s11, 256, %s23_s13, [#allocation3], %s243_s17, %s243_s17, %s244_s18  }
   0x6   :  { %s245_s19 = smov [#allocation5]  }
   0x7   :  { %s41_s20 = sshll.u32 %s245_s19, 4  ;;  %s42_s20 = int_to_ptr.vmem [resolvable:$true] %s41_s20 }
   0x8   :  { %47 = dma.hbm_to_vmem [thread:$0]  %s40_s16, 256, %s42_s20, [#allocation6], %s243_s17, %s243_s17, %s244_s18  }
   0x9   :  { %236 = dma.done.wait [#allocation3], 256  }
   0xa   :  { %237 = vsyncadd [#allocation3], 4294967040 }
   0xb   :  { %238 = dma.done.wait [#allocation6], 256  }
   0xc   :  { %239 = vsyncadd [#allocation6], 4294967040  ;;  %v71_v0 = vld [vmem:[#allocation2] sm:$0xff]  ;;  %v72_v1 = vld [vmem:[#allocation2 + $0x8] sm:$0xff]  ;;  %s246_s0 = smov [#allocation7]   ;;  %s139_s23 = sshll.u32 %s273_s2, 4  ;;  %s140_s23 = int_to_ptr.hbm [resolvable:$true] %s139_s23 }
   0xd   :  { %v73_v2 = vld [vmem:[#allocation5] sm:$0xff]  ;;  %v74_v3 = vld [vmem:[#allocation5 + $0x8] sm:$0xff]  ;;  %s137_s1 = sshll.u32 %s246_s0, 4  ;;  %s138_s1 = int_to_ptr.vmem [resolvable:$true] %s137_s1 }
   0xe   :  { %v75_v4 = vsub.f32 %v71_v0, %v73_v2  ;;  %v76_v5 = vsub.f32 %v72_v1, %v74_v3 }
  0x10   :  { %v77_v6 = vmul.f32 %v75_v4, %v75_v4  ;;  %v78_v7 = vmul.f32 %v76_v5, %v76_v5 }
  0x12   :  { %v79_v8 = vadd.f32 1e-06, %v77_v6  ;;  %v80_v9 = vadd.f32 1e-06, %v78_v7 }
  0x14   :  { %160 = vrsqrt.f32 %v79_v8  ;;  %vm88_vm0 = vcmp.eq.f32.partialorder %v79_v8, inf  ;;  %v91_v21 = vand.u32 2147483648, %v79_v8  ;;  %vm90_vm1 = vcmp.eq.f32.partialorder %v79_v8, 0.0 }
  0x15   :  { %162 = vrsqrt.f32 %v80_v9  ;;  %vm100_vm2 = vcmp.eq.f32.partialorder %v80_v9, inf  ;;  %v103_v24 = vand.u32 2147483648, %v80_v9  ;;  %vm102_vm3 = vcmp.eq.f32.partialorder %v80_v9, 0.0 }
  0x1a   :  { %v161_v10 = vpop.eup %160 }
  0x1b   :  { %v163_v11 = vpop.eup %162  ;;  %v82_v12 = vmul.f32 %v161_v10, %v79_v8 }
  0x1c   :  { %v94_v13 = vmul.f32 %v163_v11, %v80_v9 }
  0x1d   :  { %v83_v14 = vmul.f32 %v161_v10, %v82_v12 }
  0x1e   :  { %v95_v15 = vmul.f32 %v163_v11, %v94_v13 }
  0x1f   :  { %v84_v16 = vmul.f32 0.5, %v83_v14 }
  0x20   :  { %v96_v17 = vmul.f32 0.5, %v95_v15 }
  0x21   :  { %v85_v18 = vsub.f32 1.5, %v84_v16 }
  0x22   :  { %v97_v19 = vsub.f32 1.5, %v96_v17 }
  0x23   :  { %v86_v20 = vmul.f32 %v161_v10, %v85_v18 }
  0x24   :  { %v98_v22 = vmul.f32 %v163_v11, %v97_v19 }
  0x25   :  { %v87_v23 = vmul.f32 %v86_v20, %v79_v8 }
  0x26   :  { %v99_v25 = vmul.f32 %v98_v22, %v80_v9 }
  0x27   :  { %v89_v26 = vsel %vm88_vm0, %v79_v8, %v87_v23 }
  0x28   :  { %v92_v27 = vsel %vm90_vm1, %v91_v21, %v89_v26  ;;  %v101_v28 = vsel %vm100_vm2, %v80_v9, %v99_v25 }
  0x29   :  { %v104_v29 = vsel %vm102_vm3, %v103_v24, %v101_v28 }
  0x2a   :  { %v111_v30 = vadd.f32 %v104_v29, %v92_v27 }
  0x2c   :  { %113 = vst [vmem:[#allocation7] sm:$0xff] %v111_v30 }
  0x2d   :  { %142 = dma.vmem_to_hbm [thread:$0]  %s138_s1, 128, %s140_s23, [#allocation4]  }
  0x2e   :  { %240 = dma.done.wait [#allocation4], 128  }
  0x2f   :  { %241 = vsyncadd [#allocation4], 4294967168 }
  0x30   :  { %147 = vsyncpa [#allocation3], 1 }
  0x31   :  { %148 = vsyncpa [#allocation6], 1 }
  0x32   :  { %149 = vsyncpa [#allocation4], 1 }

</bundles_post_ra>
